<compile_context>
chip_gen: v7x
topology: tpu7x:2x2x1
jax: 0.10.0
libtpu: 0.0.40
codegen_flags: <defaults>
</compile_context>

<pallas_src>
import jax
import jax.numpy as jnp
from jax.experimental import pallas as pl
from jax.experimental.pallas import tpu as pltpu


# ----------------------------- kernels -------------------------------------


def _mlp_tail(x, w2_ref, b2_ref, w3_ref, b3_ref, w4_ref, b4_ref, out_ref):
    # Linear(512, 128) + ReLU
    x = jnp.dot(x, w2_ref[...], preferred_element_type=jnp.float32) + b2_ref[...]
    x = jnp.maximum(x, 0.0)
    # Linear(128, 16) + ReLU
    x = jnp.dot(x, w3_ref[...], preferred_element_type=jnp.float32) + b3_ref[...]
    x = jnp.maximum(x, 0.0)
    # Linear(16, 1): VPU multiply + lane reduce (w4 is passed as a (1, 16) row),
    # avoiding a nearly-empty 1-lane MXU pass.
    y = jnp.sum(x * w4_ref[...], axis=-1, keepdims=True) + b4_ref[...]   # (tb, 1)
    # Lane-dense store: one unmasked (1, 1, tb) slab per grid step.  The
    # (tb,1)->(1,tb) transpose rides the idle XLU; the vst slot is the scarce one.
    out_ref[...] = y.T[None, :, :]


def _fused_kernel(h_ref, w1_ref, b1_ref, w2_ref, b2_ref,
                  w3_ref, b3_ref, w4_ref, b4_ref, out_ref):
    # Node-sum folded into layer 1:
    #   sum_n h[:, n, :] @ W1  ==  h_flat @ tile(W1, (N, 1))
    x = jnp.dot(h_ref[...], w1_ref[...], preferred_element_type=jnp.float32) + b1_ref[...]
    x = jnp.maximum(x, 0.0)
    _mlp_tail(x, w2_ref, b2_ref, w3_ref, b3_ref, w4_ref, b4_ref, out_ref)


def _sum_kernel(h_ref, w1_ref, b1_ref, w2_ref, b2_ref,
                w3_ref, b3_ref, w4_ref, b4_ref, out_ref):
    # Fallback for very large N*F: XLU sublane node-sum, then the plain layer 1.
    hg = jnp.sum(h_ref[...], axis=1)
    x = jnp.dot(hg, w1_ref[...], preferred_element_type=jnp.float32) + b1_ref[...]
    x = jnp.maximum(x, 0.0)
    _mlp_tail(x, w2_ref, b2_ref, w3_ref, b3_ref, w4_ref, b4_ref, out_ref)


# ----------------------------- wrapper --------------------------------------

_MAX_TB = 8192                # batch-tile cap (multi-MiB h tiles at N*F ~ 256)
_TILED_W1_LIMIT = 8 << 20     # use the fused (tiled-W1) path while W1 fits VMEM


def _round_up(x, m):
    return (x + m - 1) // m * m


def _vmem_capacity_bytes():
    # Generation-aware VMEM: 128 MiB/TC on v5e/v6e, 64 MiB/TC on v7x.
    try:
        return int(pltpu.get_tpu_info().vmem_capacity_bytes)
    except Exception:
        return 64 << 20       # conservative v7x-class fallback


def _pick_block_b(B, h_row_bytes, inter_row_bytes, w_bytes, vmem_cap):
    """Largest batch tile whose working set fits ~70% of this chip's VMEM."""
    budget = int(vmem_cap * 0.7)

    def need(t):
        return (2 * t * h_row_bytes        # double-buffered h tile
                + t * inter_row_bytes      # MLP layer intermediates
                + 2 * w_bytes              # resident weights/biases
                + (4 << 20))               # headroom / internal scratch

    tb = min(_MAX_TB, B)
    if tb < B:
        tb = max(8, (tb // 8) * 8)         # keep partial-B blocks (8,128)-legal
    while tb > 8 and need(tb) > budget:
        tb = max(8, (tb // 2) // 8 * 8)
    return tb, need(tb)


def anee_global_aggregation(h, params):
    """h: [B, N, F] float32 node features (equal-size graphs). Returns [B, 1]."""
    (w1, b1), (w2, b2), (w3, b3), (w4, b4) = params
    B, N, F = h.shape
    H1, H2, H3 = w1.shape[1], w2.shape[1], w3.shape[1]
    NF = N * F
    w4_row = w4.reshape(1, -1)             # (16, 1) -> (1, 16) row for VPU reduce

    vmem_cap = _vmem_capacity_bytes()
    inter_row_bytes = 4 * (H1 + H2 + _round_up(H3, 128))
    w_tail_bytes = 4 * (H1 + H1 * H2 + H2 + H2 * _round_up(H3, 128)
                        + 2 * _round_up(H3, 128) + 128)
    const = lambda i: (0, 0)

    fused = 4 * NF * H1 <= _TILED_W1_LIMIT
    if fused:
        kernel = _fused_kernel
        h_in = h.reshape(B, NF)            # lane-dense h stream
        w1_in = jnp.tile(w1, (N, 1))       # (N*F, H1): folds node-sum into layer 1
        h_row_bytes = 4 * _round_up(NF, 128)
        w_bytes = 4 * NF * H1 + w_tail_bytes
        tb, need = _pick_block_b(B, h_row_bytes, inter_row_bytes, w_bytes, vmem_cap)
        h_spec = pl.BlockSpec((tb, NF), lambda i: (i, 0))
        w1_spec = pl.BlockSpec((NF, H1), const)
        flops = B * 2 * (NF * H1 + H1 * H2 + H2 * H3 + H3)
    else:
        # TODO(synk): variable-size graphs would need a per-graph node-count
        # mask (scalar prefetch); a dense equal-node [B, N, F] layout is assumed.
        kernel = _sum_kernel
        h_in = h
        w1_in = w1
        h_row_bytes = 4 * N * _round_up(F, 128)
        w_bytes = 4 * F * H1 + w_tail_bytes
        tb, need = _pick_block_b(B, h_row_bytes, inter_row_bytes, w_bytes, vmem_cap)
        h_spec = pl.BlockSpec((tb, N, F), lambda i: (i, 0, 0))
        w1_spec = pl.BlockSpec((F, H1), const)
        flops = B * ((N - 1) * F + 2 * (F * H1 + H1 * H2 + H2 * H3 + H3))

    num_tiles = pl.cdiv(B, tb)
    grid = (num_tiles,)

    in_specs = [
        h_spec,
        w1_spec, pl.BlockSpec((1, H1), const),
        pl.BlockSpec((H1, H2), const), pl.BlockSpec((1, H2), const),
        pl.BlockSpec((H2, H3), const), pl.BlockSpec((1, H3), const),
        pl.BlockSpec((1, H3), const), pl.BlockSpec((1, 1), const),
    ]
    # Lane-dense output: one (1, 1, tb) slab per grid step; reshaped to (B, 1) below.
    out_specs = pl.BlockSpec((1, 1, tb), lambda i: (i, 0, 0))
    out_shape = jax.ShapeDtypeStruct((num_tiles, 1, tb), jnp.float32)

    vmem_limit = int(min(max(vmem_cap - (8 << 20), 32 << 20),
                         max(32 << 20, need + (8 << 20))))

    bytes_accessed = 4 * (B * NF + B) + w_bytes

    out = pl.pallas_call(
        kernel,
        out_shape=out_shape,
        grid=grid,
        in_specs=in_specs,
        out_specs=out_specs,
        compiler_params=pltpu.CompilerParams(
            # TODO(synk): switch to pltpu.CORE_PARALLEL on v7x once dual-TC
            # sharding is verified in a trace; "parallel" is a no-op on
            # single-TC v5e/v6e and safe everywhere.
            dimension_semantics=("parallel",),
            vmem_limit_bytes=vmem_limit),
        cost_estimate=pl.CostEstimate(
            flops=int(flops),
            transcendentals=0,
            bytes_accessed=int(bytes_accessed)),
    )(h_in, w1_in, b1, w2, b2, w3, b3, w4_row, b4)

    # Drop padding rows of the (possibly partial) last tile, restore [B, 1].
    return out.reshape(-1)[:B].reshape(B, 1)


# ------------------------- params / reference -------------------------------


def init_params(key, in_feats):
    """Deterministic MLP parameter init. Weights are [in, out] (torch W.T)."""
    dims = [(in_feats, 512), (512, 128), (128, 16), (16, 1)]
    params = []
    for i, (din, dout) in enumerate(dims):
        kw, kb = jax.random.split(jax.random.fold_in(key, i))
        bound = 1.0 / jnp.sqrt(jnp.float32(din))   # torch Linear default init range
        w = jax.random.uniform(kw, (din, dout), jnp.float32, -bound, bound)
        b = jax.random.uniform(kb, (1, dout), jnp.float32, -bound, bound)
        params.append((w, b))
    return params


def reference(h, params):
    hg = jnp.sum(h, axis=1)
    (w1, b1), (w2, b2), (w3, b3), (w4, b4) = params
    x = jnp.maximum(hg @ w1 + b1, 0.0)
    x = jnp.maximum(x @ w2 + b2, 0.0)
    x = jnp.maximum(x @ w3 + b3, 0.0)
    return x @ w4 + b4


if __name__ == "__main__":
    key = jax.random.PRNGKey(0)
    B, N, F = 2, 8, 32   # batch graphs, nodes per graph, in_feats

    kh, kp = jax.random.split(key)
    h = jax.random.normal(kh, (B, N, F), dtype=jnp.float32)
    params = init_params(kp, F)

    out = jax.block_until_ready(anee_global_aggregation(h, params))

    ref = reference(h, params)
    assert out.shape == (B, 1)
    assert jnp.allclose(out, ref, atol=1e-4, rtol=1e-4)
    print("KERNEL_OK")
</pallas_src>

<mosaic_0001>
module attributes {stable_mosaic.version = 11 : i64} {
  func.func @_fused_kernel(%arg0: i32, %arg1: memref<2x256xf32, #tpu.memory_space<vmem>>, %arg2: memref<256x512xf32, #tpu.memory_space<vmem>>, %arg3: memref<1x512xf32, #tpu.memory_space<vmem>>, %arg4: memref<512x128xf32, #tpu.memory_space<vmem>>, %arg5: memref<1x128xf32, #tpu.memory_space<vmem>>, %arg6: memref<128x16xf32, #tpu.memory_space<vmem>>, %arg7: memref<1x16xf32, #tpu.memory_space<vmem>>, %arg8: memref<1x16xf32, #tpu.memory_space<vmem>>, %arg9: memref<1x1xf32, #tpu.memory_space<vmem>>, %arg10: memref<1x1x2xf32, #tpu.memory_space<vmem>>) attributes {dimension_semantics = [#tpu.dimension_semantics<parallel>], iteration_bounds = array<i64: 1>, scalar_prefetch = 0 : i64, scratch_operands = 0 : i64, tpu.core_type = #tpu.core_type<tc>, window_params = [{transform_indices = @transform_0, window_bounds = array<i64: 2, 256>}, {pipeline_mode = #tpu.pipeline_mode<synchronous>, transform_indices = @transform_1, window_bounds = array<i64: 256, 512>}, {pipeline_mode = #tpu.pipeline_mode<synchronous>, transform_indices = @transform_2, window_bounds = array<i64: 1, 512>}, {pipeline_mode = #tpu.pipeline_mode<synchronous>, transform_indices = @transform_3, window_bounds = array<i64: 512, 128>}, {pipeline_mode = #tpu.pipeline_mode<synchronous>, transform_indices = @transform_4, window_bounds = array<i64: 1, 128>}, {pipeline_mode = #tpu.pipeline_mode<synchronous>, transform_indices = @transform_5, window_bounds = array<i64: 128, 16>}, {pipeline_mode = #tpu.pipeline_mode<synchronous>, transform_indices = @transform_6, window_bounds = array<i64: 1, 16>}, {pipeline_mode = #tpu.pipeline_mode<synchronous>, transform_indices = @transform_7, window_bounds = array<i64: 1, 16>}, {pipeline_mode = #tpu.pipeline_mode<synchronous>, transform_indices = @transform_8, window_bounds = array<i64: 1, 1>}, {transform_indices = @transform_9, window_bounds = array<i64: 1, 1, 2>}]} {
    %c0 = arith.constant 0 : index
    %c0_0 = arith.constant 0 : index
    %0 = vector.load %arg1[%c0, %c0_0] : memref<2x256xf32, #tpu.memory_space<vmem>>, vector<2x256xf32>
    %c0_1 = arith.constant 0 : index
    %c0_2 = arith.constant 0 : index
    %1 = vector.load %arg2[%c0_1, %c0_2] : memref<256x512xf32, #tpu.memory_space<vmem>>, vector<256x512xf32>
    %cst = arith.constant dense<0.000000e+00> : vector<2x512xf32>
    %2 = tpu.matmul %0, %1, %cst {dimension_numbers = #tpu.dot_dimension_numbers<[1], [0], [0], [1], [0, 0, 1, 1], [], []>} : vector<2x256xf32>, vector<256x512xf32>, vector<2x512xf32> -> vector<2x512xf32>
    %c0_3 = arith.constant 0 : index
    %c0_4 = arith.constant 0 : index
    %3 = vector.load %arg3[%c0_3, %c0_4] : memref<1x512xf32, #tpu.memory_space<vmem>>, vector<1x512xf32>
    %4 = vector.broadcast %3 : vector<1x512xf32> to vector<2x512xf32>
    %5 = arith.addf %2, %4 : vector<2x512xf32>
    %cst_5 = arith.constant 0.000000e+00 : f32
    %6 = vector.broadcast %cst_5 : f32 to vector<2x512xf32>
    %7 = arith.maximumf %5, %6 : vector<2x512xf32>
    %c0_6 = arith.constant 0 : index
    %c0_7 = arith.constant 0 : index
    %8 = vector.load %arg4[%c0_6, %c0_7] : memref<512x128xf32, #tpu.memory_space<vmem>>, vector<512x128xf32>
    %cst_8 = arith.constant dense<0.000000e+00> : vector<2x128xf32>
    %9 = tpu.matmul %7, %8, %cst_8 {dimension_numbers = #tpu.dot_dimension_numbers<[1], [0], [0], [1], [0, 0, 1, 1], [], []>} : vector<2x512xf32>, vector<512x128xf32>, vector<2x128xf32> -> vector<2x128xf32>
    %c0_9 = arith.constant 0 : index
    %c0_10 = arith.constant 0 : index
    %10 = vector.load %arg5[%c0_9, %c0_10] : memref<1x128xf32, #tpu.memory_space<vmem>>, vector<1x128xf32>
    %11 = vector.broadcast %10 : vector<1x128xf32> to vector<2x128xf32>
    %12 = arith.addf %9, %11 : vector<2x128xf32>
    %cst_11 = arith.constant 0.000000e+00 : f32
    %13 = vector.broadcast %cst_11 : f32 to vector<2x128xf32>
    %14 = arith.maximumf %12, %13 : vector<2x128xf32>
    %c0_12 = arith.constant 0 : index
    %c0_13 = arith.constant 0 : index
    %15 = vector.load %arg6[%c0_12, %c0_13] : memref<128x16xf32, #tpu.memory_space<vmem>>, vector<128x16xf32>
    %cst_14 = arith.constant dense<0.000000e+00> : vector<2x16xf32>
    %16 = tpu.matmul %14, %15, %cst_14 {dimension_numbers = #tpu.dot_dimension_numbers<[1], [0], [0], [1], [0, 0, 1, 1], [], []>} : vector<2x128xf32>, vector<128x16xf32>, vector<2x16xf32> -> vector<2x16xf32>
    %c0_15 = arith.constant 0 : index
    %c0_16 = arith.constant 0 : index
    %17 = vector.load %arg7[%c0_15, %c0_16] : memref<1x16xf32, #tpu.memory_space<vmem>>, vector<1x16xf32>
    %18 = vector.broadcast %17 : vector<1x16xf32> to vector<2x16xf32>
    %19 = arith.addf %16, %18 : vector<2x16xf32>
    %cst_17 = arith.constant 0.000000e+00 : f32
    %20 = vector.broadcast %cst_17 : f32 to vector<2x16xf32>
    %21 = arith.maximumf %19, %20 : vector<2x16xf32>
    %c0_18 = arith.constant 0 : index
    %c0_19 = arith.constant 0 : index
    %22 = vector.load %arg8[%c0_18, %c0_19] : memref<1x16xf32, #tpu.memory_space<vmem>>, vector<1x16xf32>
    %23 = vector.broadcast %22 : vector<1x16xf32> to vector<2x16xf32>
    %24 = arith.mulf %21, %23 : vector<2x16xf32>
    %cst_20 = arith.constant dense<0.000000e+00> : vector<2xf32>
    %25 = vector.multi_reduction <add>, %24, %cst_20 [1] : vector<2x16xf32> to vector<2xf32>
    %26 = vector.shape_cast %25 : vector<2xf32> to vector<2x1xf32>
    %c0_21 = arith.constant 0 : index
    %c0_22 = arith.constant 0 : index
    %27 = vector.load %arg9[%c0_21, %c0_22] : memref<1x1xf32, #tpu.memory_space<vmem>>, vector<1x1xf32>
    %28 = vector.broadcast %27 : vector<1x1xf32> to vector<2x1xf32>
    %29 = arith.addf %26, %28 : vector<2x1xf32>
    %30 = tpu.transpose %29, [1, 0] : vector<2x1xf32> -> vector<1x2xf32>
    %31 = vector.shape_cast %30 : vector<1x2xf32> to vector<1x1x2xf32>
    %c0_23 = arith.constant 0 : index
    %c0_24 = arith.constant 0 : index
    %c0_25 = arith.constant 0 : index
    %32 = vector.load %arg10[%c0_23, %c0_24, %c0_25] : memref<1x1x2xf32, #tpu.memory_space<vmem>>, vector<1x1x2xf32>
    tpu.vector_store %arg10[%c0_23, %c0_24, %c0_25], %31 {strides = array<i32>} : memref<1x1x2xf32, #tpu.memory_space<vmem>>, vector<1x1x2xf32>,
    return
  }
  func.func @transform_0(%arg0: i32) -> (i32, i32) {
    %c0_i32 = arith.constant 0 : i32
    %c0_i32_0 = arith.constant 0 : i32
    return %arg0, %c0_i32 : i32, i32
  }
  func.func @transform_1(%arg0: i32) -> (i32, i32) {
    %c0_i32 = arith.constant 0 : i32
    %c0_i32_0 = arith.constant 0 : i32
    %c0_i32_1 = arith.constant 0 : i32
    return %c0_i32, %c0_i32_0 : i32, i32
  }
  func.func @transform_2(%arg0: i32) -> (i32, i32) {
    %c0_i32 = arith.constant 0 : i32
    %c0_i32_0 = arith.constant 0 : i32
    %c0_i32_1 = arith.constant 0 : i32
    return %c0_i32, %c0_i32_0 : i32, i32
  }
  func.func @transform_3(%arg0: i32) -> (i32, i32) {
    %c0_i32 = arith.constant 0 : i32
    %c0_i32_0 = arith.constant 0 : i32
    %c0_i32_1 = arith.constant 0 : i32
    return %c0_i32, %c0_i32_0 : i32, i32
  }
  func.func @transform_4(%arg0: i32) -> (i32, i32) {
    %c0_i32 = arith.constant 0 : i32
    %c0_i32_0 = arith.constant 0 : i32
    %c0_i32_1 = arith.constant 0 : i32
    return %c0_i32, %c0_i32_0 : i32, i32
  }
  func.func @transform_5(%arg0: i32) -> (i32, i32) {
    %c0_i32 = arith.constant 0 : i32
    %c0_i32_0 = arith.constant 0 : i32
    %c0_i32_1 = arith.constant 0 : i32
    return %c0_i32, %c0_i32_0 : i32, i32
  }
  func.func @transform_6(%arg0: i32) -> (i32, i32) {
    %c0_i32 = arith.constant 0 : i32
    %c0_i32_0 = arith.constant 0 : i32
    %c0_i32_1 = arith.constant 0 : i32
    return %c0_i32, %c0_i32_0 : i32, i32
  }
  func.func @transform_7(%arg0: i32) -> (i32, i32) {
    %c0_i32 = arith.constant 0 : i32
    %c0_i32_0 = arith.constant 0 : i32
    %c0_i32_1 = arith.constant 0 : i32
    return %c0_i32, %c0_i32_0 : i32, i32
  }
  func.func @transform_8(%arg0: i32) -> (i32, i32) {
    %c0_i32 = arith.constant 0 : i32
    %c0_i32_0 = arith.constant 0 : i32
    %c0_i32_1 = arith.constant 0 : i32
    return %c0_i32, %c0_i32_0 : i32, i32
  }
  func.func @transform_9(%arg0: i32) -> (i32, i32, i32) {
    %c0_i32 = arith.constant 0 : i32
    %c0_i32_0 = arith.constant 0 : i32
    %c0_i32_1 = arith.constant 0 : i32
    return %arg0, %c0_i32, %c0_i32_0 : i32, i32, i32
  }
}

</mosaic_0001>

<bundles_post_ra>
// kernel: tpu_custom_call.1
= control target key start
LH: loop header
LB: loop body
LE: loop exit
PB: predicated region body
PF: predicated region fallthrough
CT: control target
= control target key end

     0   :  { %s1340_s0 = inlined_call_operand.vmem [shape: f32[2,256], index: 0, kind: input, shape index: {}]   ;;  %s1341_s1 = inlined_call_operand.hbm [shape: f32[256,512], index: 1, kind: input, shape index: {}]   ;;  %s1342_s2 = inlined_call_operand.vmem [shape: f32[1,512], index: 2, kind: input, shape index: {}]   ;;  %s1343_s3 = inlined_call_operand.hbm [shape: f32[512,128], index: 3, kind: input, shape index: {}]   ;;  %s1344_s4 = inlined_call_operand.vmem [shape: f32[1,128], index: 4, kind: input, shape index: {}]   ;;  %s1345_s5 = inlined_call_operand.vmem [shape: f32[128,16], index: 5, kind: input, shape index: {}]   ;;  %s1346_s6 = inlined_call_operand.vmem [shape: f32[1,16], index: 6, kind: input, shape index: {}]   ;;  %s1347_s7 = inlined_call_operand.vmem [shape: f32[1,16], index: 7, kind: input, shape index: {}]   ;;  %s1348_s8 = inlined_call_operand.<no memory space> [shape: f32[1,1], index: 8, kind: input, shape index: {}]   ;;  %s1349_s9 = inlined_call_operand.hbm [shape: f32[1,1,2], index: 9, kind: output, shape index: {}]  }
   0x1   :  { %v14_v0 = vstv %s1348_s8 }
   0x2   :  { %15 = vst [vmem:[#allocation2] sm:$0x1] %v14_v0 }
   0x3   :  { %16 = vsyncpa [#allocation4], 0 }
   0x4   :  { %17 = vsyncpa [#allocation7], 0 }
   0x5   :  { %18 = vsyncpa [#allocation5], 0  ;;  %s1172_s11 = smov [#allocation3]   ;;  %s1100_s15 = scalar_lea.hbm %s1341_s1, 16384 }
   0x6   :  { %s26_s12 = sshll.u32 %s1172_s11, 4  ;;  %p1101_p0 = scmp.ne.s32.totalorder %s1341_s1, %s1100_s15  ;;  %s27_s12 = int_to_ptr.vmem [resolvable:$true] %s26_s12 }
   0x7   :  { %p1104_p1 = scmp.lt.u32.totalorder %s1100_s15, %s1341_s1 }
   0x9   :  { %p1106_p2 = pnand %p1104_p1, %p1101_p0 }
   0xb   :  { %1109 = shalt.err (!%p1106_p2)
}
   0xc   :  { %s1110_s8 = scalar_lea.vmem %s27_s12, 16384  ;;  %p1115_p4 = scmp.lt.s32.totalorder %s27_s12, %s27_s12 }
   0xd   :  { %p1111_p3 = scmp.ne.s32.totalorder %s27_s12, %s1110_s8  ;;  %p1116_p5 = scmp.lt.s32.totalorder %s1110_s8, %s1110_s8 }
   0xf   :  { %p1117_p6 = por %p1116_p5, %p1115_p4 }
  0x11   :  { %p1118_p7 = pnand %p1117_p6, %p1111_p3 }
  0x13   :  { %1121 = shalt.err (!%p1118_p7)
}
  0x14   :  { %s1173_s20 = smov 512   ;;  %s1174_s21 = smov 32  }
  0x15   :  { %32 = dma.hbm_to_vmem [thread:$0]  %s1341_s1, 16384, %s27_s12, [#allocation4], %s1173_s20, %s1173_s20, %s1174_s21  }
  0x16   :  { %s1175_s24 = smov [#allocation6]   ;;  %s1122_s28 = scalar_lea.hbm %s1343_s3, 8192 }
  0x17   :  { %s40_s25 = sshll.u32 %s1175_s24, 4  ;;  %p1123_p8 = scmp.ne.s32.totalorder %s1343_s3, %s1122_s28  ;;  %s41_s25 = int_to_ptr.vmem [resolvable:$true] %s40_s25 }
  0x18   :  { %p1126_p9 = scmp.lt.u32.totalorder %s1122_s28, %s1343_s3 }
  0x1a   :  { %p1128_p10 = pnand %p1126_p9, %p1123_p8 }
  0x1c   :  { %1131 = shalt.err (!%p1128_p10)
}
  0x1d   :  { %s1132_s13 = scalar_lea.vmem %s41_s25, 8192  ;;  %p1137_p12 = scmp.lt.s32.totalorder %s41_s25, %s41_s25 }
  0x1e   :  { %p1133_p11 = scmp.ne.s32.totalorder %s41_s25, %s1132_s13  ;;  %p1138_p13 = scmp.lt.s32.totalorder %s1132_s13, %s1132_s13 }
  0x20   :  { %p1139_p0 = por %p1138_p13, %p1137_p12 }
  0x22   :  { %p1140_p1 = pnand %p1139_p0, %p1133_p11 }
  0x24   :  { %1143 = shalt.err (!%p1140_p1)
}
  0x25   :  { %s1176_s1 = smov 128   ;;  %s1177_s12 = smov 8  }
  0x26   :  { %46 = dma.hbm_to_vmem [thread:$0]  %s1343_s3, 8192, %s41_s25, [#allocation7], %s1176_s1, %s1176_s1, %s1177_s12  }
  0x27   :  { %1166 = dma.done.wait [#allocation4], 16384  }
  0x28   :  { %1167 = vsyncadd [#allocation4], 4294950912 }
  0x29   :  { %1168 = dma.done.wait [#allocation7], 8192  }
  0x2a   :  { %1169 = vsyncadd [#allocation7], 4294959104  ;;  %v65_v1 = vld [vmem:[#allocation3 + $0x8] sm:$0xff]  ;;  %v67_v3 = vld [vmem:[#allocation3 + $0x18] sm:$0xff]  ;;  %vm1179_vm0 = vmmov 0   ;;  %vm685_vm1 = vcmask 123904  }
  0x2b   :  { %v69_v2 = vld [vmem:[#allocation3 + $0x28] sm:$0xff]  ;;  %v71_v5 = vld [vmem:[#allocation3 + $0x38] sm:$0xff]  ;;  %v64_v6 = vld [vmem:[#allocation3] sm:$0xff]  ;;  %vm729_vm2 = vcmask 8192  }
  0x2c   :  { %v874_v4 = vpack.c.bf16 %v69_v2, %v65_v1  ;;  %v68_v7 = vld [vmem:[#allocation3 + $0x20] sm:$0xff]  ;;  %v938_v8 = vpack.c.bf16 %v71_v5, %v67_v3  ;;  %v66_v10 = vld [vmem:[#allocation3 + $0x10] sm:$0xff]  ;;  %v73_v12 = vld [vmem:[#allocation3 + $0x48] sm:$0xff] }
  0x2d   :  { %v876_v9 = vpack.c.bf16 %v68_v7, %v64_v6  ;;  %v70_v11 = vld [vmem:[#allocation3 + $0x30] sm:$0xff]  ;;  %v77_v14 = vld [vmem:[#allocation3 + $0x68] sm:$0xff]  ;;  %v75_v15 = vld [vmem:[#allocation3 + $0x58] sm:$0xff] }
  0x2e   :  { %875 = vmatprep.subr.bf16.mxu0 %v874_v4  ;;  %v940_v13 = vpack.c.bf16 %v70_v11, %v66_v10  ;;  %v79_v16 = vld [vmem:[#allocation3 + $0x78] sm:$0xff]  ;;  %939 = vmatprep.subr.bf16.mxu1 %v938_v8  ;;  %v878_v17 = vpack.c.bf16 %v77_v14, %v73_v12  ;;  %v72_v19 = vld [vmem:[#allocation3 + $0x40] sm:$0xff]  ;;  %v74_v21 = vld [vmem:[#allocation3 + $0x50] sm:$0xff] }
  0x2f   :  { %877 = vmatpush1.bf16.msra.mxu0 %v876_v9  ;;  %v942_v18 = vpack.c.bf16 %v79_v16, %v75_v15  ;;  %v76_v20 = vld [vmem:[#allocation3 + $0x60] sm:$0xff]  ;;  %v78_v23 = vld [vmem:[#allocation3 + $0x70] sm:$0xff]  ;;  %v81_v24 = vld [vmem:[#allocation3 + $0x88] sm:$0xff] }
  0x30   :  { %941 = vmatpush1.bf16.msra.mxu1 %v940_v13  ;;  %v880_v22 = vpack.c.bf16 %v76_v20, %v72_v19  ;;  %v85_v25 = vld [vmem:[#allocation3 + $0xa8] sm:$0xff]  ;;  %879 = vmatprep.subr.bf16.mxu0 %v878_v17  ;;  %v944_v26 = vpack.c.bf16 %v78_v23, %v74_v21  ;;  %v83_v28 = vld [vmem:[#allocation3 + $0x98] sm:$0xff]  ;;  %v80_v30 = vld [vmem:[#allocation3 + $0x80] sm:$0xff] }
  0x31   :  { %943 = vmatprep.subr.bf16.mxu1 %v942_v18  ;;  %v882_v27 = vpack.c.bf16 %v85_v25, %v81_v24  ;;  %v87_v29 = vld [vmem:[#allocation3 + $0xb8] sm:$0xff]  ;;  %v84_v32 = vld [vmem:[#allocation3 + $0xa0] sm:$0xff]  ;;  %v82_v33 = vld [vmem:[#allocation3 + $0x90] sm:$0xff] }
  0x32   :  { %v946_v31 = vpack.c.bf16 %v87_v29, %v83_v28  ;;  %v86_v34 = vld [vmem:[#allocation3 + $0xb0] sm:$0xff]  ;;  %v884_v35 = vpack.c.bf16 %v84_v32, %v80_v30  ;;  %v89_v36 = vld [vmem:[#allocation3 + $0xc8] sm:$0xff]  ;;  %v91_v38 = vld [vmem:[#allocation3 + $0xd8] sm:$0xff] }
  0x33   :  { %881 = vmatpush1.bf16.msra.mxu0 %v880_v22  ;;  %v93_v37 = vld [vmem:[#allocation3 + $0xe8] sm:$0xff]  ;;  %v948_v39 = vpack.c.bf16 %v86_v34, %v82_v33  ;;  %v95_v41 = vld [vmem:[#allocation3 + $0xf8] sm:$0xff]  ;;  %v88_v42 = vld [vmem:[#allocation3 + $0xc0] sm:$0xff] }
  0x34   :  { %945 = vmatpush1.bf16.msra.mxu1 %v944_v26  ;;  %883 = vmatprep.subr.bf16.mxu0 %v882_v27  ;;  %v886_v40 = vpack.c.bf16 %v93_v37, %v89_v36  ;;  %v92_v43 = vld [vmem:[#allocation3 + $0xe0] sm:$0xff]  ;;  %v950_v44 = vpack.c.bf16 %v95_v41, %v91_v38  ;;  %v90_v45 = vld [vmem:[#allocation3 + $0xd0] sm:$0xff]  ;;  %v97_v47 = vld [vmem:[#allocation3 + $0x108] sm:$0xff] }
  0x35   :  { %947 = vmatprep.subr.bf16.mxu1 %v946_v31  ;;  %v94_v46 = vld [vmem:[#allocation3 + $0xf0] sm:$0xff]  ;;  %v101_v48 = vld [vmem:[#allocation3 + $0x128] sm:$0xff]  ;;  %v99_v49 = vld [vmem:[#allocation3 + $0x118] sm:$0xff]  ;;  %v888_v51 = vpack.c.bf16 %v92_v43, %v88_v42 }
  0x36   :  { %v103_v50 = vld [vmem:[#allocation3 + $0x138] sm:$0xff]  ;;  %v952_v52 = vpack.c.bf16 %v94_v46, %v90_v45  ;;  %v890_v53 = vpack.c.bf16 %v101_v48, %v97_v47  ;;  %v96_v54 = vld [vmem:[#allocation3 + $0x100] sm:$0xff]  ;;  %v98_v56 = vld [vmem:[#allocation3 + $0x110] sm:$0xff] }
  0x37   :  { %885 = vmatpush1.bf16.msra.mxu0 %v884_v35  ;;  %v100_v55 = vld [vmem:[#allocation3 + $0x120] sm:$0xff]  ;;  %v954_v57 = vpack.c.bf16 %v103_v50, %v99_v49  ;;  %v102_v58 = vld [vmem:[#allocation3 + $0x130] sm:$0xff]  ;;  %v105_v59 = vld [vmem:[#allocation3 + $0x148] sm:$0xff] }
  0x38   :  { %949 = vmatpush1.bf16.msra.mxu1 %v948_v39  ;;  %887 = vmatprep.subr.bf16.mxu0 %v886_v40  ;;  %v109_v60 = vld [vmem:[#allocation3 + $0x168] sm:$0xff]  ;;  %v107_v61 = vld [vmem:[#allocation3 + $0x158] sm:$0xff]  ;;  %v892_v63 = vpack.c.bf16 %v100_v55, %v96_v54  ;;  %v956_v0 = vpack.c.bf16 %v102_v58, %v98_v56  ;;  %v104_v2 = vld [vmem:[#allocation3 + $0x140] sm:$0xff] }
  0x39   :  { %951 = vmatprep.subr.bf16.mxu1 %v950_v44  ;;  %v111_v62 = vld [vmem:[#allocation3 + $0x178] sm:$0xff]  ;;  %v894_v1 = vpack.c.bf16 %v109_v60, %v105_v59  ;;  %v108_v3 = vld [vmem:[#allocation3 + $0x160] sm:$0xff]  ;;  %v106_v4 = vld [vmem:[#allocation3 + $0x150] sm:$0xff] }
  0x3a   :  { %v958_v5 = vpack.c.bf16 %v111_v62, %v107_v61  ;;  %v110_v6 = vld [vmem:[#allocation3 + $0x170] sm:$0xff]  ;;  %v113_v7 = vld [vmem:[#allocation3 + $0x188] sm:$0xff]  ;;  %v115_v9 = vld [vmem:[#allocation3 + $0x198] sm:$0xff]  ;;  %v896_v11 = vpack.c.bf16 %v108_v3, %v104_v2 }
  0x3b   :  { %889 = vmatpush1.bf16.msra.mxu0 %v888_v51  ;;  %v117_v8 = vld [vmem:[#allocation3 + $0x1a8] sm:$0xff]  ;;  %v119_v10 = vld [vmem:[#allocation3 + $0x1b8] sm:$0xff]  ;;  %v960_v12 = vpack.c.bf16 %v110_v6, %v106_v4  ;;  %v112_v14 = vld [vmem:[#allocation3 + $0x180] sm:$0xff] }
  0x3c   :  { %953 = vmatpush1.bf16.msra.mxu1 %v952_v52  ;;  %891 = vmatprep.subr.bf16.mxu0 %v890_v53  ;;  %v898_v13 = vpack.c.bf16 %v117_v8, %v113_v7  ;;  %v116_v15 = vld [vmem:[#allocation3 + $0x1a0] sm:$0xff]  ;;  %v114_v16 = vld [vmem:[#allocation3 + $0x190] sm:$0xff]  ;;  %v962_v17 = vpack.c.bf16 %v119_v10, %v115_v9  ;;  %v121_v19 = vld [vmem:[#allocation3 + $0x1c8] sm:$0xff] }
  0x3d   :  { %955 = vmatprep.subr.bf16.mxu1 %v954_v57  ;;  %v118_v18 = vld [vmem:[#allocation3 + $0x1b0] sm:$0xff]  ;;  %v125_v20 = vld [vmem:[#allocation3 + $0x1e8] sm:$0xff]  ;;  %v123_v21 = vld [vmem:[#allocation3 + $0x1d8] sm:$0xff]  ;;  %v900_v23 = vpack.c.bf16 %v116_v15, %v112_v14 }
  0x3e   :  { %v127_v22 = vld [vmem:[#allocation3 + $0x1f8] sm:$0xff]  ;;  %v964_v24 = vpack.c.bf16 %v118_v18, %v114_v16  ;;  %v902_v25 = vpack.c.bf16 %v125_v20, %v121_v19  ;;  %v120_v26 = vld [vmem:[#allocation3 + $0x1c0] sm:$0xff]  ;;  %v122_v28 = vld [vmem:[#allocation3 + $0x1d0] sm:$0xff] }
  0x3f   :  { %893 = vmatpush1.bf16.msra.mxu0 %v892_v63  ;;  %v124_v27 = vld [vmem:[#allocation3 + $0x1e0] sm:$0xff]  ;;  %v966_v29 = vpack.c.bf16 %v127_v22, %v123_v21  ;;  %v126_v30 = vld [vmem:[#allocation3 + $0x1f0] sm:$0xff]  ;;  %v129_v31 = vld [vmem:[#allocation3 + $0x208] sm:$0xff] }
  0x40   :  { %957 = vmatpush1.bf16.msra.mxu1 %v956_v0  ;;  %895 = vmatprep.subr.bf16.mxu0 %v894_v1  ;;  %v133_v32 = vld [vmem:[#allocation3 + $0x228] sm:$0xff]  ;;  %v131_v33 = vld [vmem:[#allocation3 + $0x218] sm:$0xff]  ;;  %v904_v35 = vpack.c.bf16 %v124_v27, %v120_v26  ;;  %v968_v36 = vpack.c.bf16 %v126_v30, %v122_v28  ;;  %v128_v38 = vld [vmem:[#allocation3 + $0x200] sm:$0xff] }
  0x41   :  { %959 = vmatprep.subr.bf16.mxu1 %v958_v5  ;;  %v135_v34 = vld [vmem:[#allocation3 + $0x238] sm:$0xff]  ;;  %v906_v37 = vpack.c.bf16 %v133_v32, %v129_v31  ;;  %v132_v39 = vld [vmem:[#allocation3 + $0x220] sm:$0xff]  ;;  %v130_v40 = vld [vmem:[#allocation3 + $0x210] sm:$0xff] }
  0x42   :  { %v970_v41 = vpack.c.bf16 %v135_v34, %v131_v33  ;;  %v134_v42 = vld [vmem:[#allocation3 + $0x230] sm:$0xff]  ;;  %v137_v43 = vld [vmem:[#allocation3 + $0x248] sm:$0xff]  ;;  %v139_v45 = vld [vmem:[#allocation3 + $0x258] sm:$0xff]  ;;  %v908_v47 = vpack.c.bf16 %v132_v39, %v128_v38 }
  0x43   :  { %897 = vmatpush1.bf16.msra.mxu0 %v896_v11  ;;  %v141_v44 = vld [vmem:[#allocation3 + $0x268] sm:$0xff]  ;;  %v143_v46 = vld [vmem:[#allocation3 + $0x278] sm:$0xff]  ;;  %v972_v48 = vpack.c.bf16 %v134_v42, %v130_v40  ;;  %v136_v50 = vld [vmem:[#allocation3 + $0x240] sm:$0xff] }
  0x44   :  { %961 = vmatpush1.bf16.msra.mxu1 %v960_v12  ;;  %899 = vmatprep.subr.bf16.mxu0 %v898_v13  ;;  %v910_v49 = vpack.c.bf16 %v141_v44, %v137_v43  ;;  %v140_v51 = vld [vmem:[#allocation3 + $0x260] sm:$0xff]  ;;  %v138_v52 = vld [vmem:[#allocation3 + $0x250] sm:$0xff]  ;;  %v974_v53 = vpack.c.bf16 %v143_v46, %v139_v45  ;;  %v145_v55 = vld [vmem:[#allocation3 + $0x288] sm:$0xff] }
  0x45   :  { %963 = vmatprep.subr.bf16.mxu1 %v962_v17  ;;  %v142_v54 = vld [vmem:[#allocation3 + $0x270] sm:$0xff]  ;;  %v149_v56 = vld [vmem:[#allocation3 + $0x2a8] sm:$0xff]  ;;  %v147_v57 = vld [vmem:[#allocation3 + $0x298] sm:$0xff]  ;;  %v912_v59 = vpack.c.bf16 %v140_v51, %v136_v50 }
  0x46   :  { %v151_v58 = vld [vmem:[#allocation3 + $0x2b8] sm:$0xff]  ;;  %v976_v60 = vpack.c.bf16 %v142_v54, %v138_v52  ;;  %v914_v61 = vpack.c.bf16 %v149_v56, %v145_v55  ;;  %v144_v62 = vld [vmem:[#allocation3 + $0x280] sm:$0xff]  ;;  %v146_v0 = vld [vmem:[#allocation3 + $0x290] sm:$0xff] }
  0x47   :  { %901 = vmatpush1.bf16.msra.mxu0 %v900_v23  ;;  %v148_v63 = vld [vmem:[#allocation3 + $0x2a0] sm:$0xff]  ;;  %v978_v1 = vpack.c.bf16 %v151_v58, %v147_v57  ;;  %v150_v2 = vld [vmem:[#allocation3 + $0x2b0] sm:$0xff]  ;;  %v153_v3 = vld [vmem:[#allocation3 + $0x2c8] sm:$0xff] }
  0x48   :  { %965 = vmatpush1.bf16.msra.mxu1 %v964_v24  ;;  %903 = vmatprep.subr.bf16.mxu0 %v902_v25  ;;  %v157_v4 = vld [vmem:[#allocation3 + $0x2e8] sm:$0xff]  ;;  %v155_v5 = vld [vmem:[#allocation3 + $0x2d8] sm:$0xff]  ;;  %v916_v7 = vpack.c.bf16 %v148_v63, %v144_v62  ;;  %v152_v8 = vld [vmem:[#allocation3 + $0x2c0] sm:$0xff]  ;;  %v980_v9 = vpack.c.bf16 %v150_v2, %v146_v0 }
  0x49   :  { %967 = vmatprep.subr.bf16.mxu1 %v966_v29  ;;  %v159_v6 = vld [vmem:[#allocation3 + $0x2f8] sm:$0xff]  ;;  %v918_v10 = vpack.c.bf16 %v157_v4, %v153_v3  ;;  %v156_v11 = vld [vmem:[#allocation3 + $0x2e0] sm:$0xff]  ;;  %v154_v12 = vld [vmem:[#allocation3 + $0x2d0] sm:$0xff] }
  0x4a   :  { %v158_v13 = vld [vmem:[#allocation3 + $0x2f0] sm:$0xff]  ;;  %v982_v14 = vpack.c.bf16 %v159_v6, %v155_v5  ;;  %v161_v15 = vld [vmem:[#allocation3 + $0x308] sm:$0xff]  ;;  %v1262_v17 = vld.sshfl [vmem:[%s1340_s0] sm:$0x33 pattern:$0x76325410]  ;;  %v920_v21 = vpack.c.bf16 %v156_v11, %v152_v8 }
  0x4b   :  { %905 = vmatpush1.bf16.msra.mxu0 %v904_v35  ;;  %v165_v16 = vld [vmem:[#allocation3 + $0x328] sm:$0xff]  ;;  %v163_v18 = vld [vmem:[#allocation3 + $0x318] sm:$0xff]  ;;  %v222_v20 = vcombine.high %v1262_v17, %v1262_v17  ;;  %v984_v22 = vpack.c.bf16 %v158_v13, %v154_v12  ;;  %v160_v24 = vld [vmem:[#allocation3 + $0x300] sm:$0xff] }
  0x4c   :  { %969 = vmatpush1.bf16.msra.mxu1 %v968_v36  ;;  %907 = vmatprep.subr.bf16.mxu0 %v906_v37  ;;  %v167_v19 = vld [vmem:[#allocation3 + $0x338] sm:$0xff]  ;;  %v922_v23 = vpack.c.bf16 %v165_v16, %v161_v15  ;;  %v164_v25 = vld [vmem:[#allocation3 + $0x320] sm:$0xff]  ;;  %v162_v26 = vld [vmem:[#allocation3 + $0x310] sm:$0xff] }
  0x4d   :  { %971 = vmatprep.subr.bf16.mxu1 %v970_v41  ;;  %v986_v27 = vpack.c.bf16 %v167_v19, %v163_v18  ;;  %v166_v28 = vld [vmem:[#allocation3 + $0x330] sm:$0xff]  ;;  %v169_v29 = vld [vmem:[#allocation3 + $0x348] sm:$0xff]  ;;  %289 = vmatprep.mubr.f32.mxu0 %v222_v20  ;;  %v171_v31 = vld [vmem:[#allocation3 + $0x358] sm:$0xff]  ;;  %v924_v33 = vpack.c.bf16 %v164_v25, %v160_v24 }
  0x4e   :  { %v173_v30 = vld [vmem:[#allocation3 + $0x368] sm:$0xff]  ;;  %v175_v32 = vld [vmem:[#allocation3 + $0x378] sm:$0xff]  ;;  %360 = vmatprep.mubr.f32.mxu1 %v222_v20  ;;  %v988_v34 = vpack.c.bf16 %v166_v28, %v162_v26  ;;  %v168_v36 = vld [vmem:[#allocation3 + $0x340] sm:$0xff] }
  0x4f   :  { %909 = vmatpush1.bf16.msra.mxu0 %v908_v47  ;;  %v926_v35 = vpack.c.bf16 %v173_v30, %v169_v29  ;;  %v172_v37 = vld [vmem:[#allocation3 + $0x360] sm:$0xff]  ;;  %v170_v38 = vld [vmem:[#allocation3 + $0x350] sm:$0xff]  ;;  %v990_v39 = vpack.c.bf16 %v175_v32, %v171_v31  ;;  %v177_v41 = vld [vmem:[#allocation3 + $0x388] sm:$0xff] }
  0x50   :  { %973 = vmatpush1.bf16.msra.mxu1 %v972_v48  ;;  %911 = vmatprep.subr.bf16.mxu0 %v910_v49  ;;  %v174_v40 = vld [vmem:[#allocation3 + $0x370] sm:$0xff]  ;;  %v181_v42 = vld [vmem:[#allocation3 + $0x3a8] sm:$0xff]  ;;  %v179_v43 = vld [vmem:[#allocation3 + $0x398] sm:$0xff]  ;;  %v928_v45 = vpack.c.bf16 %v172_v37, %v168_v36 }
  0x51   :  { %975 = vmatprep.subr.bf16.mxu1 %v974_v53  ;;  %v183_v44 = vld [vmem:[#allocation3 + $0x3b8] sm:$0xff]  ;;  %v992_v46 = vpack.c.bf16 %v174_v40, %v170_v38  ;;  %v930_v47 = vpack.c.bf16 %v181_v42, %v177_v41  ;;  %v176_v48 = vld [vmem:[#allocation3 + $0x380] sm:$0xff]  ;;  %v178_v50 = vld [vmem:[#allocation3 + $0x390] sm:$0xff] }
  0x52   :  { %v180_v49 = vld [vmem:[#allocation3 + $0x3a0] sm:$0xff]  ;;  %v994_v51 = vpack.c.bf16 %v183_v44, %v179_v43  ;;  %v182_v52 = vld [vmem:[#allocation3 + $0x3b0] sm:$0xff]  ;;  %v185_v53 = vld [vmem:[#allocation3 + $0x3c8] sm:$0xff] }
  0x53   :  { %913 = vmatpush1.bf16.msra.mxu0 %v912_v59  ;;  %v189_v54 = vld [vmem:[#allocation3 + $0x3e8] sm:$0xff]  ;;  %v187_v55 = vld [vmem:[#allocation3 + $0x3d8] sm:$0xff]  ;;  %v932_v57 = vpack.c.bf16 %v180_v49, %v176_v48  ;;  %v996_v58 = vpack.c.bf16 %v182_v52, %v178_v50  ;;  %v186_v62 = vld [vmem:[#allocation3 + $0x3d0] sm:$0xff] }
  0x54   :  { %977 = vmatpush1.bf16.msra.mxu1 %v976_v60  ;;  %915 = vmatprep.subr.bf16.mxu0 %v914_v61  ;;  %v191_v56 = vld [vmem:[#allocation3 + $0x3f8] sm:$0xff]  ;;  %v934_v59 = vpack.c.bf16 %v189_v54, %v185_v53  ;;  %v184_v60 = vld [vmem:[#allocation3 + $0x3c0] sm:$0xff]  ;;  %v190_v0 = vld [vmem:[#allocation3 + $0x3f0] sm:$0xff] }
  0x55   :  { %979 = vmatprep.subr.bf16.mxu1 %v978_v1  ;;  %v188_v61 = vld [vmem:[#allocation3 + $0x3e0] sm:$0xff]  ;;  %v998_v63 = vpack.c.bf16 %v191_v56, %v187_v55  ;;  %v388_v2 = vld [vmem:[#allocation6 + $0x88] sm:$0xff]  ;;  %v1000_v6 = vpack.c.bf16 %v190_v0, %v186_v62  ;;  %v389_v13 = vld [vmem:[#allocation6 + $0x90] sm:$0xff] }
  0x56   :  { %v387_v1 = vld [vmem:[#allocation6 + $0x80] sm:$0xff]  ;;  %v420_v4 = vld [vmem:[#allocation6 + $0x188] sm:$0xff]  ;;  %v936_v5 = vpack.c.bf16 %v188_v61, %v184_v60  ;;  %v421_v15 = vld [vmem:[#allocation6 + $0x190] sm:$0xff] }
  0x57   :  { %917 = vmatpush1.bf16.msra.mxu0 %v916_v7  ;;  %v419_v3 = vld [vmem:[#allocation6 + $0x180] sm:$0xff]  ;;  %v1002_v7 = vpack.c.bf16 %v388_v2, %v387_v1  ;;  %v404_v12 = vld [vmem:[#allocation6 + $0x108] sm:$0xff]  ;;  %v422_v16 = vld [vmem:[#allocation6 + $0x198] sm:$0xff] }
  0x58   :  { %981 = vmatpush1.bf16.msra.mxu1 %v980_v9  ;;  %919 = vmatprep.subr.bf16.mxu0 %v918_v10  ;;  %v371_v8 = vld [vmem:[#allocation6] sm:$0xff]  ;;  %v372_v9 = vld [vmem:[#allocation6 + $0x8] sm:$0xff]  ;;  %v1034_v11 = vpack.c.bf16 %v420_v4, %v419_v3  ;;  %v1038_v24 = vpack.c.bf16 %v422_v16, %v421_v15  ;;  %v406_v25 = vld [vmem:[#allocation6 + $0x118] sm:$0xff] }
  0x59   :  { %983 = vmatprep.subr.bf16.mxu1 %v982_v14  ;;  %v403_v10 = vld [vmem:[#allocation6 + $0x100] sm:$0xff]  ;;  %v390_v14 = vld [vmem:[#allocation6 + $0x98] sm:$0xff]  ;;  %v1004_v18 = vpack.c.bf16 %v372_v9, %v371_v8  ;;  %v424_v29 = vld [vmem:[#allocation6 + $0x1a8] sm:$0xff] }
  0x5a   :  { %v1036_v19 = vpack.c.bf16 %v404_v12, %v403_v10  ;;  %v1006_v20 = vpack.c.bf16 %v390_v14, %v389_v13  ;;  %v391_v26 = vld [vmem:[#allocation6 + $0xa0] sm:$0xff]  ;;  %v408_v37 = vld [vmem:[#allocation6 + $0x128] sm:$0xff]  ;;  %v393_v38 = vld [vmem:[#allocation6 + $0xb0] sm:$0xff] }
  0x5b   :  { %921 = vmatpush1.bf16.msra.mxu0 %v920_v21  ;;  %v373_v21 = vld [vmem:[#allocation6 + $0x10] sm:$0xff]  ;;  %v423_v28 = vld [vmem:[#allocation6 + $0x1a0] sm:$0xff]  ;;  %v426_v41 = vld [vmem:[#allocation6 + $0x1b8] sm:$0xff] }
  0x5c   :  { %985 = vmatpush1.bf16.msra.mxu1 %v984_v22  ;;  %923 = vmatprep.subr.bf16.mxu0 %v922_v23  ;;  %v374_v22 = vld [vmem:[#allocation6 + $0x18] sm:$0xff]  ;;  %v405_v23 = vld [vmem:[#allocation6 + $0x110] sm:$0xff]  ;;  %v1042_v36 = vpack.c.bf16 %v424_v29, %v423_v28  ;;  %v395_v49 = vld [vmem:[#allocation6 + $0xc0] sm:$0xff] }
  0x5d   :  { %987 = vmatprep.subr.bf16.mxu1 %v986_v27  ;;  %v392_v27 = vld [vmem:[#allocation6 + $0xa8] sm:$0xff]  ;;  %v1008_v30 = vpack.c.bf16 %v374_v22, %v373_v21  ;;  %v1040_v31 = vpack.c.bf16 %v406_v25, %v405_v23  ;;  %v425_v40 = vld [vmem:[#allocation6 + $0x1b0] sm:$0xff]  ;;  %v410_v48 = vld [vmem:[#allocation6 + $0x138] sm:$0xff] }
  0x5e   :  { %v1010_v32 = vpack.c.bf16 %v392_v27, %v391_v26  ;;  %v377_v44 = vld [vmem:[#allocation6 + $0x30] sm:$0xff]  ;;  %v396_v50 = vld [vmem:[#allocation6 + $0xc8] sm:$0xff]  ;;  %v379_v56 = vld [vmem:[#allocation6 + $0x40] sm:$0xff] }
  0x5f   :  { %925 = vmatpush1.bf16.msra.mxu0 %v924_v33  ;;  %v375_v33 = vld [vmem:[#allocation6 + $0x20] sm:$0xff]  ;;  %v428_v52 = vld [vmem:[#allocation6 + $0x1c8] sm:$0xff]  ;;  %v1018_v55 = vpack.c.bf16 %v396_v50, %v395_v49  ;;  %v397_v61 = vld [vmem:[#allocation6 + $0xd0] sm:$0xff] }
  0x60   :  { %989 = vmatpush1.bf16.msra.mxu1 %v988_v34  ;;  %927 = vmatprep.subr.bf16.mxu0 %v926_v35  ;;  %v376_v34 = vld [vmem:[#allocation6 + $0x28] sm:$0xff]  ;;  %v407_v35 = vld [vmem:[#allocation6 + $0x120] sm:$0xff]  ;;  %v398_v62 = vld [vmem:[#allocation6 + $0xd8] sm:$0xff] }
  0x61   :  { %991 = vmatprep.subr.bf16.mxu1 %v990_v39  ;;  %v394_v39 = vld [vmem:[#allocation6 + $0xb8] sm:$0xff]  ;;  %v1012_v42 = vpack.c.bf16 %v376_v34, %v375_v33  ;;  %v412_v60 = vld [vmem:[#allocation6 + $0x148] sm:$0xff]  ;;  %v1022_v3 = vpack.c.bf16 %v398_v62, %v397_v61  ;;  %v381_v4 = vld [vmem:[#allocation6 + $0x50] sm:$0xff] }
  0x62   :  { %v1014_v43 = vpack.c.bf16 %v394_v39, %v393_v38  ;;  %v430_v0 = vld [vmem:[#allocation6 + $0x1d8] sm:$0xff]  ;;  %v399_v9 = vld [vmem:[#allocation6 + $0xe0] sm:$0xff]  ;;  %v400_v10 = vld [vmem:[#allocation6 + $0xe8] sm:$0xff] }
  0x63   :  { %929 = vmatpush1.bf16.msra.mxu0 %v928_v45  ;;  %v378_v45 = vld [vmem:[#allocation6 + $0x38] sm:$0xff]  ;;  %v432_v12 = vld [vmem:[#allocation6 + $0x1e8] sm:$0xff]  ;;  %v1026_v15 = vpack.c.bf16 %v400_v10, %v399_v9  ;;  %v433_v26 = vld [vmem:[#allocation6 + $0x1f0] sm:$0xff] }
  0x64   :  { %993 = vmatpush1.bf16.msra.mxu1 %v992_v46  ;;  %931 = vmatprep.subr.bf16.mxu0 %v930_v47  ;;  %v409_v46 = vld [vmem:[#allocation6 + $0x130] sm:$0xff]  ;;  %v1046_v47 = vpack.c.bf16 %v426_v41, %v425_v40  ;;  %v1016_v53 = vpack.c.bf16 %v378_v45, %v377_v44  ;;  %v414_v8 = vld [vmem:[#allocation6 + $0x158] sm:$0xff]  ;;  %v416_v22 = vld [vmem:[#allocation6 + $0x168] sm:$0xff] }
  0x65   :  { %995 = vmatprep.subr.bf16.mxu1 %v994_v51  ;;  %v427_v51 = vld [vmem:[#allocation6 + $0x1c0] sm:$0xff]  ;;  %v1048_v54 = vpack.c.bf16 %v410_v48, %v409_v46  ;;  %v402_v25 = vld [vmem:[#allocation6 + $0xf8] sm:$0xff]  ;;  %v385_v29 = vld [vmem:[#allocation6 + $0x70] sm:$0xff] }
  0x66   :  { %v434_v28 = vld [vmem:[#allocation6 + $0x1f8] sm:$0xff]  ;;  %v417_v33 = vld [vmem:[#allocation6 + $0x170] sm:$0xff] }
  0x67   :  { %933 = vmatpush1.bf16.msra.mxu0 %v932_v57  ;;  %v380_v57 = vld [vmem:[#allocation6 + $0x48] sm:$0xff]  ;;  %v418_v34 = vld [vmem:[#allocation6 + $0x178] sm:$0xff] }
  0x68   :  { %997 = vmatpush1.bf16.msra.mxu1 %v996_v58  ;;  %935 = vmatprep.subr.bf16.mxu0 %v934_v59  ;;  %v411_v58 = vld [vmem:[#allocation6 + $0x140] sm:$0xff]  ;;  %v1050_v59 = vpack.c.bf16 %v428_v52, %v427_v51  ;;  %v1020_v1 = vpack.c.bf16 %v380_v57, %v379_v56  ;;  %v585_v62 = vld [vmem:[%s1345_s5 + $0x10] sm:$0xff] }
  0x69   :  { %999 = vmatprep.subr.bf16.mxu1 %v998_v63  ;;  %v429_v63 = vld [vmem:[#allocation6 + $0x1d0] sm:$0xff]  ;;  %v1052_v2 = vpack.c.bf16 %v412_v60, %v411_v58  ;;  %v192_v40 = vld [vmem:[%s1342_s2] sm:$0xf]  ;;  %v584_v52 = vld [vmem:[%s1345_s5 + $0x8] sm:$0xff] }
  0x6a   :  { %v583_v51 = vld [vmem:[%s1345_s5] sm:$0xff]  ;;  %v593_v10 = vld [vmem:[%s1345_s5 + $0x50] sm:$0xff] }
  0x6b   :  { %937 = vmatpush1.bf16.msra.mxu0 %v936_v5  ;;  %v382_v5 = vld [vmem:[#allocation6 + $0x58] sm:$0xff] }
  0x6c   :  { %1001 = vmatpush1.bf16.msra.mxu1 %v1000_v6  ;;  %1003 = vmatprep.subr.bf16.mxu0 %v1002_v7  ;;  %v413_v6 = vld [vmem:[#allocation6 + $0x150] sm:$0xff]  ;;  %v1054_v7 = vpack.c.bf16 %v430_v0, %v429_v63  ;;  %v1024_v13 = vpack.c.bf16 %v382_v5, %v381_v4 }
  0x6d   :  { %1035 = vmatprep.subr.bf16.mxu1 %v1034_v11  ;;  %v431_v11 = vld [vmem:[#allocation6 + $0x1e0] sm:$0xff]  ;;  %v1056_v14 = vpack.c.bf16 %v414_v8, %v413_v6  ;;  %v586_v63 = vld [vmem:[%s1345_s5 + $0x18] sm:$0xff]  ;;  %v589_v4 = vld [vmem:[%s1345_s5 + $0x30] sm:$0xff] }
  0x6e   :  { %290 = vmatmul.mubr.f32.vlgmr.msra.gmra.mrb[0].mxu0 %v1262_v17  ;;  %v1058_v16 = vpack.c.bf16 %v432_v12, %v431_v11  ;;  %v1070_v0 = vpack.c.bf16 %v586_v63, %v585_v62  ;;  %v590_v5 = vld [vmem:[%s1345_s5 + $0x38] sm:$0xff]  ;;  %v592_v8 = vld [vmem:[%s1345_s5 + $0x48] sm:$0xff] }
  0x6f   :  { %361 = vmatmul.mubr.f32.vlgmr.msra.gmra.mrb[0].mxu1 %v1262_v17  ;;  %1005 = vmatpush3.bf16.msra.mxu0 %v1004_v18  ;;  %v1044_v17 = vpack.c.bf16 %v408_v37, %v407_v35  ;;  %v383_v18 = vld [vmem:[#allocation6 + $0x60] sm:$0xff]  ;;  %v1064_v35 = vpack.c.bf16 %v418_v34, %v417_v33  ;;  %v194_v37 = vlaneseq  ;;  %v1076_v6 = vpack.c.bf16 %v590_v5, %v589_v4  ;;  %v594_v11 = vld [vmem:[%s1345_s5 + $0x58] sm:$0xff] }
  0x70   :  { %1037 = vmatpush3.bf16.msra.mxu1 %v1036_v19  ;;  %1007 = vmatprep.subr.bf16.mxu0 %v1006_v20  ;;  %v384_v19 = vld [vmem:[#allocation6 + $0x68] sm:$0xff]  ;;  %v415_v20 = vld [vmem:[#allocation6 + $0x160] sm:$0xff]  ;;  %v1082_v12 = vpack.c.bf16 %v594_v11, %v593_v10 }
  0x71   :  { %1039 = vmatprep.subr.bf16.mxu1 %v1038_v24  ;;  %v1028_v21 = vpack.c.bf16 %v384_v19, %v383_v18  ;;  %v1060_v23 = vpack.c.bf16 %v416_v22, %v415_v20  ;;  %v401_v24 = vld [vmem:[#allocation6 + $0xf0] sm:$0xff]  ;;  %v195_v38 = vshrl.u32 %v194_v37, 7  ;;  %v1180_v20 = vmov 0.0  }
  0x72   :  { %v1030_v27 = vpack.c.bf16 %v402_v25, %v401_v24  ;;  %v598_v18 = vld [vmem:[%s1345_s5 + $0x78] sm:$0xff] }
  0x73   :  { %1009 = vmatpush3.bf16.msra.mxu0 %v1008_v30  ;;  %v386_v30 = vld [vmem:[#allocation6 + $0x78] sm:$0xff]  ;;  %v196_v39 = vsub.s32 0, %v195_v38  ;;  %v204_v41 = vsub.s32 2, %v195_v38 }
  0x74   :  { %1041 = vmatpush3.bf16.msra.mxu1 %v1040_v31  ;;  %1011 = vmatprep.subr.bf16.mxu0 %v1010_v32  ;;  %v1062_v31 = vpack.c.bf16 %v434_v28, %v433_v26  ;;  %v1032_v32 = vpack.c.bf16 %v386_v30, %v385_v29 }
  0x75   :  { %1043 = vmatprep.subr.bf16.mxu1 %v1042_v36  ;;  %v1178_v36 = vmov 0.0|0.0   ;;  %v205_v44 = vrot.slane %v192_v40, %v204_v41 }
  0x77   :  { %1013 = vmatpush3.bf16.msra.mxu0 %v1012_v42  ;;  %v200_v42 = vsub.s32 1, %v195_v38 }
  0x78   :  { %1045 = vmatpush3.bf16.msra.mxu1 %v1044_v17  ;;  %1015 = vmatprep.subr.bf16.mxu0 %v1014_v43  ;;  %v208_v17 = vsub.s32 3, %v195_v38  ;;  %v197_v43 = vrot.slane %v192_v40, %v196_v39  ;;  %v751_v39 = vld [vmem:[#allocation2] ss:$0 sm:$0xff] }
  0x79   :  { %1047 = vmatprep.subr.bf16.mxu1 %v1046_v47  ;;  %v201_v45 = vrot.slane %v192_v40, %v200_v42 }
  0x7a   :  { %v209_v46 = vrot.slane %v192_v40, %v208_v17 }
  0x7b   :  { %1017 = vmatpush3.bf16.msra.mxu0 %v1016_v53 }
  0x7c   :  { %1049 = vmatpush3.bf16.msra.mxu1 %v1048_v54  ;;  %1019 = vmatprep.subr.bf16.mxu0 %v1018_v55 }
  0x7d   :  { %1051 = vmatprep.subr.bf16.mxu1 %v1050_v59  ;;  %v1067_v59 = vpack.c.bf16 %v584_v52, %v583_v51 }
  0x7f   :  { %1021 = vmatpush3.bf16.msra.mxu0 %v1020_v1  ;;  %v587_v1 = vld [vmem:[%s1345_s5 + $0x20] sm:$0xff] }
  0x80   :  { %1053 = vmatpush3.bf16.msra.mxu1 %v1052_v2  ;;  %1023 = vmatprep.subr.bf16.mxu0 %v1022_v3  ;;  %v588_v2 = vld [vmem:[%s1345_s5 + $0x28] sm:$0xff] }
  0x81   :  { %1055 = vmatprep.subr.bf16.mxu1 %v1054_v7  ;;  %v1073_v3 = vpack.c.bf16 %v588_v2, %v587_v1  ;;  %v591_v7 = vld [vmem:[%s1345_s5 + $0x40] sm:$0xff] }
  0x82   :  { %v1079_v9 = vpack.c.bf16 %v592_v8, %v591_v7 }
  0x83   :  { %1025 = vmatpush3.bf16.msra.mxu0 %v1024_v13  ;;  %v595_v13 = vld [vmem:[%s1345_s5 + $0x60] sm:$0xff] }
  0x84   :  { %1057 = vmatpush3.bf16.msra.mxu1 %v1056_v14  ;;  %1027 = vmatprep.subr.bf16.mxu0 %v1026_v15  ;;  %v596_v14 = vld [vmem:[%s1345_s5 + $0x68] sm:$0xff] }
  0x85   :  { %1059 = vmatprep.subr.bf16.mxu1 %v1058_v16  ;;  %v1085_v15 = vpack.c.bf16 %v596_v14, %v595_v13  ;;  %v597_v16 = vld [vmem:[%s1345_s5 + $0x70] sm:$0xff] }
  0x86   :  { %v1088_v19 = vpack.c.bf16 %v598_v18, %v597_v16 }
  0x87   :  { %1029 = vmatpush3.bf16.msra.mxu0 %v1028_v21 }
  0x88   :  { %1061 = vmatpush3.bf16.msra.mxu1 %v1060_v23  ;;  %1031 = vmatprep.subr.bf16.mxu0 %v1030_v27  ;;  %v748_v23 = vld [vmem:[%s1344_s4] ss:$0 sm:$0xff]  ;;  %s1181_s4 = smov [#allocation8]  }
  0x89   :  { %1063 = vmatprep.subr.bf16.mxu1 %v1062_v31  ;;  %v749_v31 = vld [vmem:[%s1346_s6] ss:$0 sm:$0xff]  ;;  %s737_s27 = sshll.u32 %s1181_s4, 4  ;;  %s738_s27 = int_to_ptr.vmem [resolvable:$true] %s737_s27 }
  0x8a   :  { %s1144_s6 = scalar_lea.vmem %s738_s27, 16  ;;  %s1148_s28 = scalar_lea.vmem %s738_s27, 32 }
  0x8b   :  { %1033 = vmatpush3.bf16.msra.mxu0 %v1032_v32  ;;  %p1145_p2 = scmp.ne.s32.totalorder %s738_s27, %s1144_s6  ;;  %p1149_p3 = scmp.lt.s32.totalorder %s738_s27, %s738_s27 }
  0x8c   :  { %1065 = vmatpush3.bf16.msra.mxu1 %v1064_v35  ;;  %1066 = vmatprep.subr.bf16.mxu0 %v1178_v36  ;;  %v750_v35 = vld [vmem:[%s1347_s7] ss:$0 sm:$0xff]  ;;  %p1150_p4 = scmp.lt.s32.totalorder %s1148_s28, %s1144_s6 }
  0x8e   :  { %p1151_p5 = por %p1150_p4, %p1149_p3 }
  0x90   :  { %p1152_p6 = pnand %p1151_p5, %p1145_p2 }
 0x141   :  { %v291_v47 = vpop.f32.mrb[0].mxu0 }
 0x142   :  { %v292_v48 = vadd.f32 %v291_v47, %v197_v43  ;;  %v362_v49 = vpop.f32.mrb[0].mxu1  ;;  %v293_v50 = vpop.f32.mrb[1].mxu0 }
 0x143   :  { %v363_v53 = vadd.f32 %v362_v49, %v205_v44  ;;  %v294_v54 = vadd.f32 %v293_v50, %v201_v45  ;;  %v364_v55 = vpop.f32.mrb[1].mxu1 }
 0x144   :  { %v365_v56 = vadd.f32 %v364_v55, %v209_v46  ;;  %v367_v60 = vmax.f32 %v292_v48, 0.0 }
 0x145   :  { %v369_v57 = vmax.f32 %v363_v53, 0.0  ;;  %v368_v58 = vmax.f32 %v294_v54, 0.0 }
 0x146   :  { %v370_v61 = vmax.f32 %v365_v56, 0.0 }
 0x147   :  { %506 = vmatprep.mubr.f32.mxu0 %v368_v58 }
 0x148   :  { %576 = vmatprep.mubr.f32.mxu1 %v370_v61  ;;  %507 = vmatmul.mubr.f32.vlgmr.msra.gmra.mrb[2].mxu0 %v367_v60 }
 0x149   :  { %577 = vmatmul.mubr.f32.vlgmr.msra.gmra.mrb[2].mxu1 %v369_v57  ;;  %1068 = vmatpush3.bf16.msra.mxu0 %v1067_v59 }
 0x14a   :  { %1069 = vmatprep.subr.bf16.mxu0 %v1178_v36  ;;  %871 = vmatprep.mubr.msk.f32.mxu0 %vm1179_vm0, %v1180_v20 }
 0x14d   :  { %1071 = vmatpush3.bf16.msra.mxu0 %v1070_v0 }
 0x14e   :  { %1072 = vmatprep.subr.bf16.mxu0 %v1178_v36 }
 0x151   :  { %1074 = vmatpush3.bf16.msra.mxu0 %v1073_v3 }
 0x152   :  { %1075 = vmatprep.subr.bf16.mxu0 %v1178_v36 }
 0x155   :  { %1077 = vmatpush3.bf16.msra.mxu0 %v1076_v6 }
 0x156   :  { %1078 = vmatprep.subr.bf16.mxu0 %v1178_v36 }
 0x159   :  { %1080 = vmatpush3.bf16.msra.mxu0 %v1079_v9 }
 0x15a   :  { %1081 = vmatprep.subr.bf16.mxu0 %v1178_v36 }
 0x15d   :  { %1083 = vmatpush3.bf16.msra.mxu0 %v1082_v12 }
 0x15e   :  { %1084 = vmatprep.subr.bf16.mxu0 %v1178_v36 }
 0x161   :  { %1086 = vmatpush3.bf16.msra.mxu0 %v1085_v15 }
 0x162   :  { %1087 = vmatprep.subr.bf16.mxu0 %v1178_v36 }
 0x165   :  { %1089 = vmatpush3.bf16.msra.mxu0 %v1088_v19 }
 0x21b   :  { %v784_v21 = vpop.f32.mrb[2].mxu0 }
 0x21c   :  { %v819_v22 = vpop.f32.mrb[2].mxu1  ;;  %v785_v24 = vpop.f32.mrb[3].mxu0 }
 0x21d   :  { %v786_v25 = vadd.f32 %v785_v24, %v784_v21  ;;  %v820_v26 = vpop.f32.mrb[3].mxu1 }
 0x21e   :  { %v821_v27 = vadd.f32 %v820_v26, %v819_v22 }
 0x21f   :  { %v509_v28 = vadd.f32 %v786_v25, %v748_v23 }
 0x221   :  { %v579_v29 = vadd.f32 %v821_v27, %v509_v28 }
 0x223   :  { %v582_v30 = vmax.f32 %v579_v29, 0.0 }
 0x225   :  { %872 = vmatmul.mubr.f32.vlgmr.msra.gmra.mrb[4].mxu0 %v582_v30 }
 0x2f8   :  { %v672_v32 = vpop.f32.mrb[4].mxu0 }
 0x2f9   :  { %v673_v33 = vadd.f32 %v749_v31, %v672_v32  ;;  %v873_v34 = vpop.f32.mrb[5].mxu0 }
 0x2fb   :  { %v676_v36 = vmax.f32 %v673_v33, 0.0 }
 0x2fd   :  { %v684_v37 = vmul.f32 %v750_v35, %v676_v36 }
 0x2ff   :  { %v686_v38 = vsel %vm685_vm1, %v684_v37, 0.0 }
 0x300   :  { %687 = vadd.xlane.f32.xlu0 %v686_v38 }
 0x38d   :  { %v688_v40 = vpop.xlane.xlu0 %687 }
 0x38e   :  { %v696_v41 = vadd.f32 %v751_v39, %v688_v40 }
 0x390   :  { %697 = vxpose.xlu0.b32.start.end [1/1] (short) (narrow) %v696_v41, 8 }
 0x410   :  { %v713_v42 = vpop.trf.xlu0 }
 0x411   :  { %730 = vst.msk [vmem:[#allocation8] sm:$0x1] %vm729_vm2, %v713_v42 }
 0x412   :  { %1155 = shalt.err (!%p1152_p6)
}
 0x413   :  { %s1156_s30 = scalar_lea.hbm %s1349_s9, 16 }
 0x414   :  { %p1157_p7 = scmp.ne.s32.totalorder %s1349_s9, %s1156_s30  ;;  %p1160_p8 = scmp.lt.u32.totalorder %s1156_s30, %s1349_s9 }
 0x416   :  { %p1162_p9 = pnand %p1160_p8, %p1157_p7 }
 0x418   :  { %1165 = shalt.err (!%p1162_p9)
}
 0x419   :  { %740 = dma.vmem_to_hbm [thread:$0]  %s738_s27, 16, %s1349_s9, [#allocation5]  }
 0x41a   :  { %1170 = dma.done.wait [#allocation5], 16  }
 0x41b   :  { %1171 = vsyncadd [#allocation5], 4294967280 }
 0x41c   :  { %744 = vsyncpa [#allocation4], 1 }
 0x41d   :  { %745 = vsyncpa [#allocation7], 1 }
 0x41e   :  { %746 = vsyncpa [#allocation5], 1 }

</bundles_post_ra>
